<compile_context>
chip_gen: v7x
topology: tpu7x:2x2x1
jax: 0.10.0
libtpu: 0.0.40
codegen_flags: <defaults>
</compile_context>

<pallas_src>
import jax
import jax.numpy as jnp
from jax.experimental import pallas as pl
from jax.experimental.pallas import tpu as pltpu


def _vol_kernel(gain_ref, x_ref, o_ref):
    # gain_ref: (1,) f32 scalar in SMEM (scalar prefetch).
    # Elementwise gain + hard clip to [-1, 1] (sox clips out-of-range samples).
    g = gain_ref[0]
    o_ref[...] = jnp.clip(x_ref[...] * g, -1.0, 1.0)


def sox_vol_pallas(x, gain):
    """Apply the sox 'vol' effect with the given amplitude gain.

    x: array of shape (T,) or (C, T).
    Returns the effect output with the leading dim squeezed if it equals 1,
    mirroring the PyTorch module's forward.
    """
    x = jnp.asarray(x, dtype=jnp.float32)
    if x.ndim == 1:
        x = x[None, :]                      # unsqueeze(0), like the module
    c, t = x.shape
    n = c * t

    # ---- choose a lane-dense slab layout -------------------------------------
    # Large inputs: 1024-lane rows, 512-row blocks (2 MiB f32 per block).
    # Small inputs: 128-lane rows so padding stays tiny; single block.
    lane = 1024 if n >= 8 * 1024 else 128
    pad_unit = 8 * lane                     # keep rows a multiple of 8
    padded_n = pl.cdiv(n, pad_unit) * pad_unit

    flat = x.reshape(-1)                    # contiguous reshape: free
    if padded_n != n:
        flat = jnp.pad(flat, (0, padded_n - n))   # one-time tail pad

    rows = padded_n // lane
    block_rows = min(512, rows)             # 512 x 1024 x 4B = 2 MiB blocks
    grid = (pl.cdiv(rows, block_rows),)     # masked last block if not divisible

    slab = flat.reshape(rows, lane)
    gain_arr = jnp.asarray([gain], dtype=jnp.float32)

    out = pl.pallas_call(
        _vol_kernel,
        out_shape=jax.ShapeDtypeStruct((rows, lane), jnp.float32),
        grid_spec=pltpu.PrefetchScalarGridSpec(
            num_scalar_prefetch=1,          # gain -> SMEM, no recompile per value
            grid=grid,
            in_specs=[pl.BlockSpec((block_rows, lane), lambda i, g: (i, 0))],
            out_specs=pl.BlockSpec((block_rows, lane), lambda i, g: (i, 0)),
        ),
        compiler_params=pltpu.CompilerParams(
            dimension_semantics=("parallel",),   # shard grid across TCs (v7x megacore)
        ),
        cost_estimate=pl.CostEstimate(
            flops=3 * padded_n,               # mul + 2 clamps per element
            transcendentals=0,
            bytes_accessed=8 * padded_n,      # f32 in + f32 out
        ),
    )(gain_arr, slab)

    y = out.reshape(-1)[:n].reshape(c, t)

    # Mirror .squeeze(0): only drops the leading axis when it has size 1.
    if y.shape[0] == 1:
        y = jnp.squeeze(y, axis=0)
    return y


if __name__ == "__main__":
    key = jax.random.PRNGKey(0)
    k1, k2, k3 = jax.random.split(key, 3)

    # Multi-channel waveform: 4 channels x 2048 samples in [-1, 1].
    x_multi = jax.random.uniform(k1, (4, 2048), minval=-1.0, maxval=1.0,
                                 dtype=jnp.float32)
    # Mono waveform (1-D), exercising the unsqueeze/squeeze path.
    x_mono = jax.random.uniform(k2, (2048,), minval=-1.0, maxval=1.0,
                                dtype=jnp.float32)
    # Ragged-length mono waveform (not a multiple of the lane width) -> pad/trim path.
    x_ragged = jax.random.uniform(k3, (5000,), minval=-1.0, maxval=1.0,
                                  dtype=jnp.float32)

    gain = 1.5  # >1 so the clip path is exercised

    y_multi = jax.block_until_ready(sox_vol_pallas(x_multi, gain))
    y_mono = jax.block_until_ready(sox_vol_pallas(x_mono, gain))
    y_ragged = jax.block_until_ready(sox_vol_pallas(x_ragged, gain))
    # Different gain value: runtime scalar, no recompile.
    y_mono2 = jax.block_until_ready(sox_vol_pallas(x_mono, 0.25))

    # Reference check against plain JAX.
    ref_multi = jnp.clip(x_multi * gain, -1.0, 1.0)
    ref_mono = jnp.clip(x_mono * gain, -1.0, 1.0)
    ref_ragged = jnp.clip(x_ragged * gain, -1.0, 1.0)
    ref_mono2 = jnp.clip(x_mono * 0.25, -1.0, 1.0)

    assert y_multi.shape == (4, 2048)
    assert y_mono.shape == (2048,)
    assert y_ragged.shape == (5000,)
    assert jnp.allclose(y_multi, ref_multi, atol=1e-6)
    assert jnp.allclose(y_mono, ref_mono, atol=1e-6)
    assert jnp.allclose(y_ragged, ref_ragged, atol=1e-6)
    assert jnp.allclose(y_mono2, ref_mono2, atol=1e-6)

    print("KERNEL_OK")
</pallas_src>

<mosaic_0001>
module attributes {stable_mosaic.version = 11 : i64} {
  func.func @_vol_kernel(%arg0: i32, %arg1: memref<1xf32, #tpu.memory_space<smem>>, %arg2: memref<8x1024xf32, #tpu.memory_space<vmem>>, %arg3: memref<8x1024xf32, #tpu.memory_space<vmem>>) attributes {dimension_semantics = [#tpu.dimension_semantics<parallel>], iteration_bounds = array<i64: 1>, scalar_prefetch = 1 : i64, scratch_operands = 0 : i64, tpu.core_type = #tpu.core_type<tc>, window_params = [{transform_indices = @transform_0, window_bounds = array<i64: 8, 1024>}, {transform_indices = @transform_1, window_bounds = array<i64: 8, 1024>}]} {
    %c0 = arith.constant 0 : index
    %0 = memref.load %arg1[%c0] : memref<1xf32, #tpu.memory_space<smem>>
    %c0_0 = arith.constant 0 : index
    %c0_1 = arith.constant 0 : index
    %1 = vector.load %arg2[%c0_0, %c0_1] : memref<8x1024xf32, #tpu.memory_space<vmem>>, vector<8x1024xf32>
    %2 = vector.broadcast %0 : f32 to vector<8x1024xf32>
    %3 = arith.mulf %1, %2 : vector<8x1024xf32>
    %cst = arith.constant -1.000000e+00 : f32
    %cst_2 = arith.constant 1.000000e+00 : f32
    %4 = vector.broadcast %cst : f32 to vector<8x1024xf32>
    %5 = arith.maximumf %4, %3 : vector<8x1024xf32>
    %6 = vector.broadcast %cst_2 : f32 to vector<8x1024xf32>
    %7 = arith.minimumf %6, %5 : vector<8x1024xf32>
    %c0_3 = arith.constant 0 : index
    %c0_4 = arith.constant 0 : index
    %8 = vector.load %arg3[%c0_3, %c0_4] : memref<8x1024xf32, #tpu.memory_space<vmem>>, vector<8x1024xf32>
    tpu.vector_store %arg3[%c0_3, %c0_4], %7 {strides = array<i32>} : memref<8x1024xf32, #tpu.memory_space<vmem>>, vector<8x1024xf32>,
    return
  }
  func.func @transform_0(%arg0: i32, %arg1: memref<1xf32, #tpu.memory_space<smem>>) -> (i32, i32) {
    %c0_i32 = arith.constant 0 : i32
    %c0_i32_0 = arith.constant 0 : i32
    return %arg0, %c0_i32 : i32, i32
  }
  func.func @transform_1(%arg0: i32, %arg1: memref<1xf32, #tpu.memory_space<smem>>) -> (i32, i32) {
    %c0_i32 = arith.constant 0 : i32
    %c0_i32_0 = arith.constant 0 : i32
    return %arg0, %c0_i32 : i32, i32
  }
}

</mosaic_0001>

<bundles_post_ra>
// kernel: tpu_custom_call.1
= control target key start
LH: loop header
LB: loop body
LE: loop exit
PB: predicated region body
PF: predicated region fallthrough
CT: control target
= control target key end

     0   :  { %8 = vsyncpa [#allocation5], 0  ;;  %s182_s0 = inlined_call_operand.<no memory space> [shape: f32[1], index: 0, kind: input, shape index: {}]   ;;  %s183_s1 = inlined_call_operand.hbm [shape: f32[8,1024], index: 1, kind: input, shape index: {}]   ;;  %s184_s2 = inlined_call_operand.hbm [shape: f32[8,1024], index: 2, kind: output, shape index: {}]  }
   0x1   :  { %9 = vsyncpa [#allocation6], 0  ;;  %s138_s9 = smov [#allocation4]   ;;  %s90_s13 = scalar_lea.hbm %s183_s1, 1024 }
   0x2   :  { %s16_s10 = sshll.u32 %s138_s9, 4  ;;  %p91_p0 = scmp.ne.s32.totalorder %s183_s1, %s90_s13  ;;  %s17_s10 = int_to_ptr.vmem [resolvable:$true] %s16_s10 }
   0x3   :  { %p94_p1 = scmp.lt.u32.totalorder %s90_s13, %s183_s1 }
   0x5   :  { %p96_p2 = pnand %p94_p1, %p91_p0 }
   0x7   :  { %99 = shalt.err (!%p96_p2)
}
   0x8   :  { %s100_s18 = scalar_lea.vmem %s17_s10, 1024  ;;  %p105_p4 = scmp.lt.s32.totalorder %s17_s10, %s17_s10 }
   0x9   :  { %p101_p3 = scmp.ne.s32.totalorder %s17_s10, %s100_s18  ;;  %p106_p5 = scmp.lt.s32.totalorder %s100_s18, %s100_s18 }
   0xb   :  { %p107_p6 = por %p106_p5, %p105_p4 }
   0xd   :  { %p108_p7 = pnand %p107_p6, %p101_p3 }
   0xf   :  { %111 = shalt.err (!%p108_p7)
}
  0x10   :  { %19 = dma.hbm_to_vmem [thread:$0]  %s183_s1, 1024, %s17_s10, [#allocation5]  }
  0x11   :  { %134 = dma.done.wait [#allocation5], 1024  }
  0x12   :  { %135 = vsyncadd [#allocation5], 4294966272  ;;  %v32_v0 = vstv %s182_s0  ;;  %v24_v1 = vld [vmem:[#allocation4] sm:$0xff]  ;;  %v25_v2 = vld [vmem:[#allocation4 + $0x8] sm:$0xff]  ;;  %s139_s1 = smov [#allocation7]  }
  0x13   :  { %v26_v3 = vld [vmem:[#allocation4 + $0x10] sm:$0xff]  ;;  %v33_v4 = vmul.f32 %v32_v0, %v24_v1  ;;  %v34_v5 = vmul.f32 %v32_v0, %v25_v2  ;;  %v27_v7 = vld [vmem:[#allocation4 + $0x18] sm:$0xff]  ;;  %v28_v8 = vld [vmem:[#allocation4 + $0x20] sm:$0xff]  ;;  %s71_s0 = sshll.u32 %s139_s1, 4  ;;  %s72_s0 = int_to_ptr.vmem [resolvable:$true] %s71_s0 }
  0x14   :  { %v35_v6 = vmul.f32 %v32_v0, %v26_v3  ;;  %v29_v9 = vld [vmem:[#allocation4 + $0x28] sm:$0xff]  ;;  %v36_v10 = vmul.f32 %v32_v0, %v27_v7  ;;  %v37_v11 = vmul.f32 %v32_v0, %v28_v8  ;;  %v30_v13 = vld [vmem:[#allocation4 + $0x30] sm:$0xff]  ;;  %v31_v14 = vld [vmem:[#allocation4 + $0x38] sm:$0xff]  ;;  %s112_s23 = scalar_lea.vmem %s72_s0, 1024  ;;  %p117_p9 = scmp.lt.s32.totalorder %s72_s0, %s72_s0 }
  0x15   :  { %v38_v12 = vmul.f32 %v32_v0, %v29_v9  ;;  %v80_v15 = vclamps-f32 %v33_v4, 1.0  ;;  %v81_v16 = vclamps-f32 %v34_v5, 1.0  ;;  %v39_v18 = vmul.f32 %v32_v0, %v30_v13  ;;  %p113_p8 = scmp.ne.s32.totalorder %s72_s0, %s112_s23  ;;  %p118_p10 = scmp.lt.s32.totalorder %s112_s23, %s112_s23 }
  0x16   :  { %v82_v17 = vclamps-f32 %v35_v6, 1.0  ;;  %v83_v19 = vclamps-f32 %v36_v10, 1.0  ;;  %v84_v20 = vclamps-f32 %v37_v11, 1.0  ;;  %v40_v22 = vmul.f32 %v32_v0, %v31_v14 }
  0x17   :  { %v85_v21 = vclamps-f32 %v38_v12, 1.0  ;;  %57 = vst [vmem:[#allocation7] sm:$0xff] %v80_v15  ;;  %58 = vst [vmem:[#allocation7 + $0x8] sm:$0xff] %v81_v16  ;;  %v86_v23 = vclamps-f32 %v39_v18, 1.0  ;;  %p119_p11 = por %p118_p10, %p117_p9 }
  0x18   :  { %59 = vst [vmem:[#allocation7 + $0x10] sm:$0xff] %v82_v17  ;;  %60 = vst [vmem:[#allocation7 + $0x18] sm:$0xff] %v83_v19  ;;  %v87_v24 = vclamps-f32 %v40_v22, 1.0 }
  0x19   :  { %61 = vst [vmem:[#allocation7 + $0x20] sm:$0xff] %v84_v20  ;;  %62 = vst [vmem:[#allocation7 + $0x28] sm:$0xff] %v85_v21  ;;  %p120_p12 = pnand %p119_p11, %p113_p8 }
  0x1a   :  { %63 = vst [vmem:[#allocation7 + $0x30] sm:$0xff] %v86_v23  ;;  %64 = vst [vmem:[#allocation7 + $0x38] sm:$0xff] %v87_v24 }
  0x1b   :  { %123 = shalt.err (!%p120_p12)
}
  0x1c   :  { %s124_s26 = scalar_lea.hbm %s184_s2, 1024 }
  0x1d   :  { %p125_p13 = scmp.ne.s32.totalorder %s184_s2, %s124_s26  ;;  %p128_p0 = scmp.lt.u32.totalorder %s124_s26, %s184_s2 }
  0x1f   :  { %p130_p1 = pnand %p128_p0, %p125_p13 }
  0x21   :  { %133 = shalt.err (!%p130_p1)
}
  0x22   :  { %74 = dma.vmem_to_hbm [thread:$0]  %s72_s0, 1024, %s184_s2, [#allocation6]  }
  0x23   :  { %136 = dma.done.wait [#allocation6], 1024  }
  0x24   :  { %137 = vsyncadd [#allocation6], 4294966272 }
  0x25   :  { %78 = vsyncpa [#allocation5], 1 }
  0x26   :  { %79 = vsyncpa [#allocation6], 1 }

</bundles_post_ra>
